<compile_context>
chip_gen: v5e
topology: v5e:2x2
jax: 0.10.0
libtpu: 0.0.40
codegen_flags: <defaults>
</compile_context>

<pallas_src>
import functools

import jax
import jax.numpy as jnp
from jax.experimental import pallas as pl
from jax.experimental.pallas import tpu as pltpu


def _round_up(x, m):
    return (x + m - 1) // m * m


def _cdiv(a, b):
    return -(-a // b)


def _pick_sublane_tile(C, in_dtype_bytes, budget_bytes=12 * 1024 * 1024):
    """Largest multiple-of-8 sublane tile whose working set fits the budget.

    Per 128-pixel sublane row of one pixel tile we hold:
      * 2x double-buffered inputs: logits (C*128*in_bytes) + int32 targets (512 B)
      * ~6 f32 elementwise intermediates over the (C, TS, 128) tile
    plus the resident (double-buffered) output accumulator block as a fixed cost.
    """
    fixed = 2 * (2 + 3 * C) * 8 * 128 * 4
    per_row = 2 * (C * 128 * in_dtype_bytes + 128 * 4) + 6 * C * 128 * 4
    avail = max(budget_bytes - fixed, 1 << 20)
    ts = avail // per_row
    return int(max(8, min(1024, (ts // 8) * 8)))


def _combined_loss_kernel(x_ref, t_ref, out_ref, *,
                          num_classes, ignore_index, total_pixels,
                          tiles_per_split, sublane_tile, pad_needed):
    C = num_classes
    TS = sublane_tile
    p = pl.program_id(2)

    @pl.when(p == 0)
    def _init():
        out_ref[...] = jnp.zeros_like(out_ref)

    x = x_ref[...].astype(jnp.float32)               # (C, TS, 128) logits
    t = t_ref[...]                                   # (TS, 128) int32 labels

    valid = t != ignore_index                        # (TS, 128) CE mask
    validf = valid.astype(jnp.float32)

    # Dice path maps ignore_index -> class 0 with no masking (matches the
    # PyTorch reference; intentional — do not "fix").
    t_dice = jnp.where(valid, t, 0)
    if pad_needed:
        # Padded pixels (beyond H*W) must not contribute to the dice sums at
        # all: map them to an out-of-range class (eq all-False) and mask the
        # softmax sum.  Their targets are ignore_index, so CE already skips them.
        blk = pl.program_id(1) * tiles_per_split + p
        base = blk * (TS * 128)
        row = jax.lax.broadcasted_iota(jnp.int32, (TS, 128), 0)
        lane = jax.lax.broadcasted_iota(jnp.int32, (TS, 128), 1)
        in_range = (base + row * 128 + lane) < total_pixels
        t_dice = jnp.where(in_range, t_dice, C)

    class_iota = jax.lax.broadcasted_iota(jnp.int32, (C, TS, 128), 0)
    eq = class_iota == t_dice[None]                  # (C, TS, 128) bool mask

    # Softmax over the class axis (leading axis -> plain VPU across vregs).
    m = jnp.max(x, axis=0)                           # (TS, 128)
    xm = x - m[None]                                 # (C, TS, 128)
    ex = jnp.exp(xm)                                 # EUP
    se = jnp.sum(ex, axis=0)                         # (TS, 128)
    log_se = jnp.log(se)                             # EUP
    inv_se = pl.reciprocal(se, approx=False)         # hoisted divide
    softmax = ex * inv_se[None]                      # (C, TS, 128) VPU mult

    # Cross entropy (valid pixels): log(sum exp(x-m)) - (x_target - m).
    picked = jnp.sum(jnp.where(eq, xm, 0.0), axis=0)  # (TS, 128)
    ce_pp = (log_se - picked) * validf                # (TS, 128)

    # Per-lane partial sums: collapse TS -> 8 by grouping whole (8,128) vreg
    # tiles (pure VPU adds); cross-lane reductions are deferred to JAX.
    g = TS // 8
    ce_tile = ce_pp.reshape(g, 8, 128).sum(axis=0)                      # (8,128)
    cnt_tile = validf.reshape(g, 8, 128).sum(axis=0)                    # (8,128)
    inter_tile = jnp.where(eq, softmax, 0.0).reshape(C, g, 8, 128).sum(axis=1)
    if pad_needed:
        sm_for_sum = softmax * in_range.astype(jnp.float32)[None]
    else:
        sm_for_sum = softmax
    sin_tile = sm_for_sum.reshape(C, g, 8, 128).sum(axis=1)             # (C,8,128)
    stg_tile = eq.astype(jnp.float32).reshape(C, g, 8, 128).sum(axis=1)

    # Output block is the accumulator (resident across the arbitrary p axis).
    out_ref[0] += ce_tile
    out_ref[1] += cnt_tile
    out_ref[2:2 + C] += inter_tile
    out_ref[2 + C:2 + 2 * C] += sin_tile
    out_ref[2 + 2 * C:2 + 3 * C] += stg_tile


def combined_loss(logits_nchw, targets_n1hw, *, weight=0.5, smooth=1e-6,
                  ignore_index=255):
    """logits: (N, C, H, W) float; targets: (N, 1, H, W) int. Returns scalar."""
    N, C, H, W = logits_nchw.shape
    P = H * W

    # 2-way pixel-range split keeps both v7x TensorCores busy for N==1 / odd N;
    # on 1-TC chips it is essentially free (same total grid steps).
    psplit = 1 if N % 2 == 0 else 2

    in_bytes = jnp.dtype(logits_nchw.dtype).itemsize
    ts_budget = _pick_sublane_tile(C, in_bytes)

    s_needed = _cdiv(P, 128)                  # sublane rows of 128 pixels
    per_split = _cdiv(s_needed, psplit)
    num_p = max(1, _cdiv(per_split, ts_budget))
    TS = _round_up(_cdiv(per_split, num_p), 8)
    S_pad = TS * num_p * psplit
    P_pad = S_pad * 128
    pad_needed = (P_pad != P)

    x = logits_nchw.reshape(N, C, P)
    t = targets_n1hw.reshape(N, P).astype(jnp.int32)
    if pad_needed:
        x = jnp.pad(x, ((0, 0), (0, 0), (0, P_pad - P)))
        t = jnp.pad(t, ((0, 0), (0, P_pad - P)), constant_values=ignore_index)
    x = x.reshape(N, C, S_pad, 128)
    t = t.reshape(N, S_pad, 128)

    R = 2 + 3 * C   # rows: 0 ce_sum, 1 valid_cnt, then C x (inter, sin, stg)

    kernel = functools.partial(
        _combined_loss_kernel,
        num_classes=C, ignore_index=int(ignore_index), total_pixels=P,
        tiles_per_split=num_p, sublane_tile=TS, pad_needed=pad_needed)

    parts = pl.pallas_call(
        kernel,
        out_shape=jax.ShapeDtypeStruct((N, psplit, R, 8, 128), jnp.float32),
        grid_spec=pltpu.PrefetchScalarGridSpec(
            num_scalar_prefetch=0,
            grid=(N, psplit, num_p),
            in_specs=[
                pl.BlockSpec((None, C, TS, 128),
                             lambda n, sp, p: (n, 0, sp * num_p + p, 0)),
                pl.BlockSpec((None, TS, 128),
                             lambda n, sp, p: (n, sp * num_p + p, 0)),
            ],
            out_specs=pl.BlockSpec((None, None, R, 8, 128),
                                   lambda n, sp, p: (n, sp, 0, 0, 0)),
        ),
        compiler_params=pltpu.CompilerParams(
            dimension_semantics=("parallel", "parallel", "arbitrary"),
            vmem_limit_bytes=32 * 1024 * 1024,
        ),
    )(x, t)

    # Tiny cross-lane / cross-sample reduction in plain JAX.
    sums = jnp.sum(parts, axis=(1, 3, 4))          # (N, R)
    ce_sum = jnp.sum(sums[:, 0])
    ce_cnt = jnp.sum(sums[:, 1])                   # reference: div-by-0 if all ignored
    inter = sums[:, 2:2 + C]                       # (N, C)
    sin = sums[:, 2 + C:2 + 2 * C]
    stg = sums[:, 2 + 2 * C:2 + 3 * C]
    dice = (2.0 * inter + smooth) / (sin + stg + smooth)
    ce_loss = ce_sum / ce_cnt
    dl_loss = 1.0 - jnp.mean(dice)
    return weight * ce_loss + (1.0 - weight) * dl_loss


def combined_loss_reference(logits, targets, *, weight=0.5, smooth=1e-6,
                            ignore_index=255):
    """Pure-JAX reference mirroring the PyTorch module."""
    t = targets[:, 0]                                     # (N, H, W)
    valid = (t != ignore_index)
    t0 = jnp.where(valid, t, 0)
    logsm = jax.nn.log_softmax(logits, axis=1)
    onehot = jax.nn.one_hot(t0, logits.shape[1], axis=1)  # (N, C, H, W)
    ce_pix = -jnp.sum(onehot * logsm, axis=1)
    ce = jnp.sum(ce_pix * valid) / jnp.sum(valid)
    sm = jax.nn.softmax(logits, axis=1)
    inter = jnp.sum(sm * onehot, axis=(2, 3))
    dice = (2.0 * inter + smooth) / (
        jnp.sum(sm, axis=(2, 3)) + jnp.sum(onehot, axis=(2, 3)) + smooth)
    dl = 1.0 - jnp.mean(dice)
    return weight * ce + (1.0 - weight) * dl


if __name__ == "__main__":
    key = jax.random.PRNGKey(0)
    k_logits, k_labels, k_ignore = jax.random.split(key, 3)

    N, C, H, W = 2, 4, 16, 16
    logits = jax.random.normal(k_logits, (N, C, H, W), dtype=jnp.float32)
    labels = jax.random.randint(k_labels, (N, 1, H, W), 0, C, dtype=jnp.int32)
    # Sprinkle in some ignore_index=255 pixels.
    ignore_mask = jax.random.uniform(k_ignore, (N, 1, H, W)) < 0.1
    targets = jnp.where(ignore_mask, 255, labels)

    # Batch case (no pixel core-split).
    loss = jax.block_until_ready(combined_loss(logits, targets, weight=0.5,
                                               smooth=1e-6))
    ref = combined_loss_reference(logits, targets, weight=0.5, smooth=1e-6)
    assert jnp.allclose(loss, ref, atol=1e-5, rtol=1e-5), (loss, ref)

    # Single-sample case exercising the 2-way pixel core-split (v7x path).
    loss1 = jax.block_until_ready(combined_loss(logits[:1], targets[:1],
                                                weight=0.5, smooth=1e-6))
    ref1 = combined_loss_reference(logits[:1], targets[:1], weight=0.5,
                                   smooth=1e-6)
    assert jnp.allclose(loss1, ref1, atol=1e-5, rtol=1e-5), (loss1, ref1)

    print("KERNEL_OK")
</pallas_src>

<mosaic_0001>
module attributes {stable_mosaic.version = 11 : i64} {
  func.func @_combined_loss_kernel(%arg0: i32, %arg1: i32, %arg2: i32, %arg3: memref<1x4x8x128xf32, #tpu.memory_space<vmem>>, %arg4: memref<1x8x128xi32, #tpu.memory_space<vmem>>, %arg5: memref<1x1x14x8x128xf32, #tpu.memory_space<vmem>>) attributes {dimension_semantics = [#tpu.dimension_semantics<parallel>, #tpu.dimension_semantics<parallel>, #tpu.dimension_semantics<arbitrary>], iteration_bounds = array<i64: 2, 1, 1>, scalar_prefetch = 0 : i64, scratch_operands = 0 : i64, tpu.core_type = #tpu.core_type<tc>, window_params = [{transform_indices = @transform_0, window_bounds = array<i64: 1, 4, 8, 128>}, {transform_indices = @transform_1, window_bounds = array<i64: 1, 8, 128>}, {transform_indices = @transform_2, window_bounds = array<i64: 1, 1, 14, 8, 128>}]} {
    %c0_i32 = arith.constant 0 : i32
    %0 = arith.cmpi eq, %arg2, %c0_i32 : i32
    %1 = arith.extui %0 : i1 to i32
    %c0_i32_0 = arith.constant 0 : i32
    %2 = arith.cmpi ne, %1, %c0_i32_0 : i32
    scf.if %2 {
      %cst_63 = arith.constant 0.000000e+00 : f32
      %96 = vector.broadcast %cst_63 : f32 to vector<14x8x128xf32>
      %c0_64 = arith.constant 0 : index
      %c0_65 = arith.constant 0 : index
      %c0_66 = arith.constant 0 : index
      %c0_67 = arith.constant 0 : index
      %c0_68 = arith.constant 0 : index
      %97 = vector.load %arg5[%c0_64, %c0_65, %c0_66, %c0_67, %c0_68] : memref<1x1x14x8x128xf32, #tpu.memory_space<vmem>>, vector<1x1x14x8x128xf32>
      %98 = vector.shape_cast %97 : vector<1x1x14x8x128xf32> to vector<14x8x128xf32>
      %99 = vector.shape_cast %96 : vector<14x8x128xf32> to vector<1x1x14x8x128xf32>
      tpu.vector_store %arg5[%c0_64, %c0_65, %c0_66, %c0_67, %c0_68], %99 {strides = array<i32>} : memref<1x1x14x8x128xf32, #tpu.memory_space<vmem>>, vector<1x1x14x8x128xf32>,
    } else {
    }
    %c0 = arith.constant 0 : index
    %c0_1 = arith.constant 0 : index
    %c0_2 = arith.constant 0 : index
    %c0_3 = arith.constant 0 : index
    %3 = vector.load %arg3[%c0, %c0_1, %c0_2, %c0_3] : memref<1x4x8x128xf32, #tpu.memory_space<vmem>>, vector<1x4x8x128xf32>
    %4 = vector.shape_cast %3 : vector<1x4x8x128xf32> to vector<4x8x128xf32>
    %c0_4 = arith.constant 0 : index
    %c0_5 = arith.constant 0 : index
    %c0_6 = arith.constant 0 : index
    %5 = vector.load %arg4[%c0_4, %c0_5, %c0_6] : memref<1x8x128xi32, #tpu.memory_space<vmem>>, vector<1x8x128xi32>
    %6 = vector.shape_cast %5 : vector<1x8x128xi32> to vector<8x128xi32>
    %c255_i32 = arith.constant 255 : i32
    %7 = vector.broadcast %c255_i32 : i32 to vector<8x128xi32>
    %8 = arith.cmpi ne, %6, %7 : vector<8x128xi32>
    %9 = arith.extui %8 : vector<8x128xi1> to vector<8x128xi32>
    %10 = arith.sitofp %9 : vector<8x128xi32> to vector<8x128xf32>
    %c0_i32_7 = arith.constant 0 : i32
    %11 = vector.broadcast %c0_i32_7 : i32 to vector<8x128xi32>
    %12 = arith.select %8, %6, %11 : vector<8x128xi1>, vector<8x128xi32>
    %c1_i32 = arith.constant 1 : i32
    %13 = arith.muli %arg1, %c1_i32 : i32
    %14 = arith.addi %13, %arg2 : i32
    %c1024_i32 = arith.constant 1024 : i32
    %15 = arith.muli %14, %c1024_i32 : i32
    %16 = tpu.iota {dimensions = array<i32: 0>} : vector<8x128xi32>
    %17 = tpu.iota {dimensions = array<i32: 1>} : vector<8x128xi32>
    %c128_i32 = arith.constant 128 : i32
    %18 = vector.broadcast %c128_i32 : i32 to vector<8x128xi32>
    %19 = arith.muli %16, %18 : vector<8x128xi32>
    %20 = vector.broadcast %15 : i32 to vector<8x128xi32>
    %21 = arith.addi %20, %19 : vector<8x128xi32>
    %22 = arith.addi %21, %17 : vector<8x128xi32>
    %c256_i32 = arith.constant 256 : i32
    %23 = vector.broadcast %c256_i32 : i32 to vector<8x128xi32>
    %24 = arith.cmpi slt, %22, %23 : vector<8x128xi32>
    %c4_i32 = arith.constant 4 : i32
    %25 = vector.broadcast %c4_i32 : i32 to vector<8x128xi32>
    %26 = arith.select %24, %12, %25 : vector<8x128xi1>, vector<8x128xi32>
    %27 = tpu.iota {dimensions = array<i32: 0>} : vector<4x8x128xi32>
    %28 = vector.shape_cast %26 : vector<8x128xi32> to vector<1x8x128xi32>
    %29 = vector.broadcast %28 : vector<1x8x128xi32> to vector<4x8x128xi32>
    %30 = arith.cmpi eq, %27, %29 : vector<4x8x128xi32>
    %cst = arith.constant dense<0xFF800000> : vector<8x128xf32>
    %31 = vector.multi_reduction <maximumf>, %4, %cst [0] : vector<4x8x128xf32> to vector<8x128xf32>
    %32 = vector.shape_cast %31 : vector<8x128xf32> to vector<1x8x128xf32>
    %33 = vector.broadcast %32 : vector<1x8x128xf32> to vector<4x8x128xf32>
    %34 = arith.subf %4, %33 : vector<4x8x128xf32>
    %35 = math.exp %34 : vector<4x8x128xf32>
    %cst_8 = arith.constant dense<0.000000e+00> : vector<8x128xf32>
    %36 = vector.multi_reduction <add>, %35, %cst_8 [0] : vector<4x8x128xf32> to vector<8x128xf32>
    %37 = math.log %36 : vector<8x128xf32>
    %38 = tpu.reciprocal %36 : vector<8x128xf32> -> vector<8x128xf32>
    %39 = vector.shape_cast %38 : vector<8x128xf32> to vector<1x8x128xf32>
    %40 = vector.broadcast %39 : vector<1x8x128xf32> to vector<4x8x128xf32>
    %41 = arith.mulf %35, %40 : vector<4x8x128xf32>
    %cst_9 = arith.constant 0.000000e+00 : f32
    %42 = vector.broadcast %cst_9 : f32 to vector<4x8x128xf32>
    %43 = arith.select %30, %34, %42 : vector<4x8x128xi1>, vector<4x8x128xf32>
    %cst_10 = arith.constant dense<0.000000e+00> : vector<8x128xf32>
    %44 = vector.multi_reduction <add>, %43, %cst_10 [0] : vector<4x8x128xf32> to vector<8x128xf32>
    %45 = arith.subf %37, %44 : vector<8x128xf32>
    %46 = arith.mulf %45, %10 : vector<8x128xf32>
    %47 = vector.shape_cast %46 : vector<8x128xf32> to vector<1x8x128xf32>
    %cst_11 = arith.constant dense<0.000000e+00> : vector<8x128xf32>
    %48 = vector.multi_reduction <add>, %47, %cst_11 [0] : vector<1x8x128xf32> to vector<8x128xf32>
    %49 = vector.shape_cast %10 : vector<8x128xf32> to vector<1x8x128xf32>
    %cst_12 = arith.constant dense<0.000000e+00> : vector<8x128xf32>
    %50 = vector.multi_reduction <add>, %49, %cst_12 [0] : vector<1x8x128xf32> to vector<8x128xf32>
    %cst_13 = arith.constant 0.000000e+00 : f32
    %51 = vector.broadcast %cst_13 : f32 to vector<4x8x128xf32>
    %52 = arith.select %30, %41, %51 : vector<4x8x128xi1>, vector<4x8x128xf32>
    %53 = vector.shape_cast %52 : vector<4x8x128xf32> to vector<4x1x8x128xf32>
    %cst_14 = arith.constant dense<0.000000e+00> : vector<4x8x128xf32>
    %54 = vector.multi_reduction <add>, %53, %cst_14 [1] : vector<4x1x8x128xf32> to vector<4x8x128xf32>
    %55 = arith.extui %24 : vector<8x128xi1> to vector<8x128xi32>
    %56 = arith.sitofp %55 : vector<8x128xi32> to vector<8x128xf32>
    %57 = vector.shape_cast %56 : vector<8x128xf32> to vector<1x8x128xf32>
    %58 = vector.broadcast %57 : vector<1x8x128xf32> to vector<4x8x128xf32>
    %59 = arith.mulf %41, %58 : vector<4x8x128xf32>
    %60 = vector.shape_cast %59 : vector<4x8x128xf32> to vector<4x1x8x128xf32>
    %cst_15 = arith.constant dense<0.000000e+00> : vector<4x8x128xf32>
    %61 = vector.multi_reduction <add>, %60, %cst_15 [1] : vector<4x1x8x128xf32> to vector<4x8x128xf32>
    %62 = arith.extui %30 : vector<4x8x128xi1> to vector<4x8x128xi32>
    %63 = arith.sitofp %62 : vector<4x8x128xi32> to vector<4x8x128xf32>
    %64 = vector.shape_cast %63 : vector<4x8x128xf32> to vector<4x1x8x128xf32>
    %cst_16 = arith.constant dense<0.000000e+00> : vector<4x8x128xf32>
    %65 = vector.multi_reduction <add>, %64, %cst_16 [1] : vector<4x1x8x128xf32> to vector<4x8x128xf32>
    %c0_17 = arith.constant 0 : index
    %c0_18 = arith.constant 0 : index
    %c0_19 = arith.constant 0 : index
    %c0_20 = arith.constant 0 : index
    %c0_21 = arith.constant 0 : index
    %66 = vector.load %arg5[%c0_17, %c0_18, %c0_19, %c0_20, %c0_21] : memref<1x1x14x8x128xf32, #tpu.memory_space<vmem>>, vector<1x1x1x8x128xf32>
    %67 = vector.shape_cast %66 : vector<1x1x1x8x128xf32> to vector<8x128xf32>
    %68 = arith.addf %67, %48 : vector<8x128xf32>
    %c0_22 = arith.constant 0 : index
    %c0_23 = arith.constant 0 : index
    %c0_24 = arith.constant 0 : index
    %c0_25 = arith.constant 0 : index
    %c0_26 = arith.constant 0 : index
    %69 = vector.load %arg5[%c0_22, %c0_23, %c0_24, %c0_25, %c0_26] : memref<1x1x14x8x128xf32, #tpu.memory_space<vmem>>, vector<1x1x1x8x128xf32>
    %70 = vector.shape_cast %69 : vector<1x1x1x8x128xf32> to vector<8x128xf32>
    %71 = vector.shape_cast %68 : vector<8x128xf32> to vector<1x1x1x8x128xf32>
    tpu.vector_store %arg5[%c0_22, %c0_23, %c0_24, %c0_25, %c0_26], %71 {strides = array<i32>} : memref<1x1x14x8x128xf32, #tpu.memory_space<vmem>>, vector<1x1x1x8x128xf32>,
    %c0_27 = arith.constant 0 : index
    %c0_28 = arith.constant 0 : index
    %c1 = arith.constant 1 : index
    %c0_29 = arith.constant 0 : index
    %c0_30 = arith.constant 0 : index
    %72 = vector.load %arg5[%c0_27, %c0_28, %c1, %c0_29, %c0_30] : memref<1x1x14x8x128xf32, #tpu.memory_space<vmem>>, vector<1x1x1x8x128xf32>
    %73 = vector.shape_cast %72 : vector<1x1x1x8x128xf32> to vector<8x128xf32>
    %74 = arith.addf %73, %50 : vector<8x128xf32>
    %c0_31 = arith.constant 0 : index
    %c0_32 = arith.constant 0 : index
    %c1_33 = arith.constant 1 : index
    %c0_34 = arith.constant 0 : index
    %c0_35 = arith.constant 0 : index
    %75 = vector.load %arg5[%c0_31, %c0_32, %c1_33, %c0_34, %c0_35] : memref<1x1x14x8x128xf32, #tpu.memory_space<vmem>>, vector<1x1x1x8x128xf32>
    %76 = vector.shape_cast %75 : vector<1x1x1x8x128xf32> to vector<8x128xf32>
    %77 = vector.shape_cast %74 : vector<8x128xf32> to vector<1x1x1x8x128xf32>
    tpu.vector_store %arg5[%c0_31, %c0_32, %c1_33, %c0_34, %c0_35], %77 {strides = array<i32>} : memref<1x1x14x8x128xf32, #tpu.memory_space<vmem>>, vector<1x1x1x8x128xf32>,
    %c0_36 = arith.constant 0 : index
    %c0_37 = arith.constant 0 : index
    %c2 = arith.constant 2 : index
    %c0_38 = arith.constant 0 : index
    %c0_39 = arith.constant 0 : index
    %78 = vector.load %arg5[%c0_36, %c0_37, %c2, %c0_38, %c0_39] : memref<1x1x14x8x128xf32, #tpu.memory_space<vmem>>, vector<1x1x4x8x128xf32>
    %79 = vector.shape_cast %78 : vector<1x1x4x8x128xf32> to vector<4x8x128xf32>
    %80 = arith.addf %79, %54 : vector<4x8x128xf32>
    %c0_40 = arith.constant 0 : index
    %c0_41 = arith.constant 0 : index
    %c2_42 = arith.constant 2 : index
    %c0_43 = arith.constant 0 : index
    %c0_44 = arith.constant 0 : index
    %81 = vector.load %arg5[%c0_40, %c0_41, %c2_42, %c0_43, %c0_44] : memref<1x1x14x8x128xf32, #tpu.memory_space<vmem>>, vector<1x1x4x8x128xf32>
    %82 = vector.shape_cast %81 : vector<1x1x4x8x128xf32> to vector<4x8x128xf32>
    %83 = vector.shape_cast %80 : vector<4x8x128xf32> to vector<1x1x4x8x128xf32>
    tpu.vector_store %arg5[%c0_40, %c0_41, %c2_42, %c0_43, %c0_44], %83 {strides = array<i32>} : memref<1x1x14x8x128xf32, #tpu.memory_space<vmem>>, vector<1x1x4x8x128xf32>,
    %c0_45 = arith.constant 0 : index
    %c0_46 = arith.constant 0 : index
    %c6 = arith.constant 6 : index
    %c0_47 = arith.constant 0 : index
    %c0_48 = arith.constant 0 : index
    %84 = vector.load %arg5[%c0_45, %c0_46, %c6, %c0_47, %c0_48] : memref<1x1x14x8x128xf32, #tpu.memory_space<vmem>>, vector<1x1x4x8x128xf32>
    %85 = vector.shape_cast %84 : vector<1x1x4x8x128xf32> to vector<4x8x128xf32>
    %86 = arith.addf %85, %61 : vector<4x8x128xf32>
    %c0_49 = arith.constant 0 : index
    %c0_50 = arith.constant 0 : index
    %c6_51 = arith.constant 6 : index
    %c0_52 = arith.constant 0 : index
    %c0_53 = arith.constant 0 : index
    %87 = vector.load %arg5[%c0_49, %c0_50, %c6_51, %c0_52, %c0_53] : memref<1x1x14x8x128xf32, #tpu.memory_space<vmem>>, vector<1x1x4x8x128xf32>
    %88 = vector.shape_cast %87 : vector<1x1x4x8x128xf32> to vector<4x8x128xf32>
    %89 = vector.shape_cast %86 : vector<4x8x128xf32> to vector<1x1x4x8x128xf32>
    tpu.vector_store %arg5[%c0_49, %c0_50, %c6_51, %c0_52, %c0_53], %89 {strides = array<i32>} : memref<1x1x14x8x128xf32, #tpu.memory_space<vmem>>, vector<1x1x4x8x128xf32>,
    %c0_54 = arith.constant 0 : index
    %c0_55 = arith.constant 0 : index
    %c10 = arith.constant 10 : index
    %c0_56 = arith.constant 0 : index
    %c0_57 = arith.constant 0 : index
    %90 = vector.load %arg5[%c0_54, %c0_55, %c10, %c0_56, %c0_57] : memref<1x1x14x8x128xf32, #tpu.memory_space<vmem>>, vector<1x1x4x8x128xf32>
    %91 = vector.shape_cast %90 : vector<1x1x4x8x128xf32> to vector<4x8x128xf32>
    %92 = arith.addf %91, %65 : vector<4x8x128xf32>
    %c0_58 = arith.constant 0 : index
    %c0_59 = arith.constant 0 : index
    %c10_60 = arith.constant 10 : index
    %c0_61 = arith.constant 0 : index
    %c0_62 = arith.constant 0 : index
    %93 = vector.load %arg5[%c0_58, %c0_59, %c10_60, %c0_61, %c0_62] : memref<1x1x14x8x128xf32, #tpu.memory_space<vmem>>, vector<1x1x4x8x128xf32>
    %94 = vector.shape_cast %93 : vector<1x1x4x8x128xf32> to vector<4x8x128xf32>
    %95 = vector.shape_cast %92 : vector<4x8x128xf32> to vector<1x1x4x8x128xf32>
    tpu.vector_store %arg5[%c0_58, %c0_59, %c10_60, %c0_61, %c0_62], %95 {strides = array<i32>} : memref<1x1x14x8x128xf32, #tpu.memory_space<vmem>>, vector<1x1x4x8x128xf32>,
    return
  }
  func.func @transform_0(%arg0: i32, %arg1: i32, %arg2: i32) -> (i32, i32, i32, i32) {
    %c1_i32 = arith.constant 1 : i32
    %0 = arith.muli %arg1, %c1_i32 : i32
    %1 = arith.addi %0, %arg2 : i32
    %c0_i32 = arith.constant 0 : i32
    %c0_i32_0 = arith.constant 0 : i32
    %c0_i32_1 = arith.constant 0 : i32
    return %arg0, %c0_i32, %1, %c0_i32_0 : i32, i32, i32, i32
  }
  func.func @transform_1(%arg0: i32, %arg1: i32, %arg2: i32) -> (i32, i32, i32) {
    %c1_i32 = arith.constant 1 : i32
    %0 = arith.muli %arg1, %c1_i32 : i32
    %1 = arith.addi %0, %arg2 : i32
    %c0_i32 = arith.constant 0 : i32
    %c0_i32_0 = arith.constant 0 : i32
    return %arg0, %1, %c0_i32 : i32, i32, i32
  }
  func.func @transform_2(%arg0: i32, %arg1: i32, %arg2: i32) -> (i32, i32, i32, i32, i32) {
    %c0_i32 = arith.constant 0 : i32
    %c0_i32_0 = arith.constant 0 : i32
    %c0_i32_1 = arith.constant 0 : i32
    %c0_i32_2 = arith.constant 0 : i32
    return %arg0, %arg1, %c0_i32, %c0_i32_0, %c0_i32_1 : i32, i32, i32, i32, i32
  }
}

</mosaic_0001>

<bundles_post_ra>
// kernel: tpu_custom_call.1
= control target key start
LH: loop header
LB: loop body
LE: loop exit
PB: predicated region body
PF: predicated region fallthrough
CT: control target
= control target key end

     0   :  { %7 = vsyncpa [#allocation3], 0  ;;  %s1022_s0 = inlined_call_operand.hbm [shape: f32[2,4,8,128], index: 0, kind: input, shape index: {}]   ;;  %s1023_s1 = inlined_call_operand.hbm [shape: s32[2,8,128], index: 1, kind: input, shape index: {}]   ;;  %s1024_s2 = inlined_call_operand.hbm [shape: f32[2,1,14,8,128], index: 2, kind: output, shape index: {}]  }
   0x1   :  { %9 = vsyncpa [#allocation3 + $0x1], 0 }
   0x2   :  { %10 = vsyncpa [#allocation6], 0 }
   0x3   :  { %12 = vsyncpa [#allocation6 + $0x1], 0 }
   0x4   :  { %13 = vsyncpa [#allocation4], 0 }
   0x5   :  { %15 = vsyncpa [#allocation4 + $0x1], 0  ;;  %s841_s9 = smov 0   ;;  %s843_s10 = smov 0  }
   0x6   :  { %s845_s11 = smov 0   ;;  %s847_s12 = smov 0  }
   0x7   :  { %s849_s13 = smov 0   ;;  %s851_s14 = smov 0  }
   0x8 LB: > { %s539_s15 = sadd.s32 4294967295, %s819_s14   ;;  %s540_s16 = sadd.s32 4294967294, %s819_s14   ;;  %s819_s14 = sphi %s851_s14, %s21_s14   ;;  %s815_s13 = sphi %s849_s13, %s1034_s13   ;;  %s811_s12 = sphi %s847_s12, %s1033_s12   ;;  %s807_s11 = sphi %s845_s11, %s1032_s11   ;;  %s803_s10 = sphi %s843_s10, %s1031_s10   ;;  %s799_s9 = sphi %s841_s9, %s1030_s9  }
   0x9   : > { %s40_s17 = sadd.s32 1, %s815_s13  ;;  %s51_s18 = sadd.s32 1, %s807_s11 }
   0xa   : > { %p42_p0 = scmp.ge.s32.totalorder %s40_s17, 2  ;;  %p58_p1 = scmp.ne.s32.totalorder %s807_s11, %s803_s10 }
   0xb   : > { %p59_p2 = scmp.eq.s32.totalorder %s819_s14, 0  ;;  %p64_p3 = scmp.ne.s32.totalorder %s803_s10, %s799_s9 }
   0xc   : > { %s1036_s17 = smov (%p42_p0, %s40_s17), 0  ;;  %p65_p5 = scmp.eq.s32.totalorder %s539_s15, 0 }
   0xd   : > { %p882_p4 = por %p59_p2, %p58_p1  ;;  %s46_s20 = ssub.s32 %s815_s13, %s1036_s17 }
   0xe   : > { %p120_p6 = scmp.eq.s32.totalorder %s539_s15, 1  ;;  %p49_p7 = scmp.eq.s32.totalorder %s46_s20, 0 }
   0xf   : > { %p888_p8 = por %p65_p5, %p64_p3  ;;  %p126_p10 = scmp.eq.s32.totalorder %s540_s16, 1 }
  0x10   : > { %p892_p9 = por %p120_p6, %p58_p1  ;;  %p542_p12 = scmp.ge.s32.totalorder %s819_s14, 2 }
  0x11   : > { %s897_s23 = scalar_select %p49_p7, %s807_s11, %s51_s18  }
  0x12   : > { %p899_p11 = por %p126_p10, %p64_p3  ;;  %p606_p13 = scmp.lt.s32.totalorder %s819_s14, 2 }
  0x13   : > { %s146_s25 = sand.u32 1, %s807_s11   ;;  %s586_s27 = sshll.u32 %s815_s13, 5 }
  0x14   : > { %s543_s26 = sshll.u32 %s146_s25, 5  ;;  %s157_s30 = scalar_lea.hbm %s1022_s0, %s586_s27 }
  0x15   : > { %s150_s3 = scalar_lea.vmem [#allocation2], %s543_s26  ;;  %s158_s5 = sshll.u32 %s157_s30, 4  ;;  %s159_s5 = int_to_ptr.hbm [resolvable:$true] %s158_s5 }
  0x16   : > { %s160_s4 = sshll.u32 %s150_s3, 4  ;;  %p912_p0 = pnand %p606_p13, %p882_p4  ;;  %s161_s4 = int_to_ptr.vmem [resolvable:$true] %s160_s4 }
  0x17   : > { %p548_p1 = scmp.ge.s32.totalorder %s819_s14, 1  ;;  %s147_s7 = scalar_lea.sflag [#allocation3], %s146_s25 }
  0x18   : > { %s821_s8 = smov 128   ;;  %s822_s15 = smov 8  }
  0x19   : > { %598 = dma.hbm_to_vmem [thread:$0]  (!%p912_p0), %s159_s5, 512, %s161_s4, %s147_s7, %s821_s8, %s821_s8, %s822_s15  }
  0x1a   : > { %p189_p2 = scmp.lt.s32.totalorder %s819_s14, 3  ;;  %s546_s16 = sshll.u32 %s146_s25, 3 }
  0x1b   : > { %s547_s18 = sshll.u32 %s815_s13, 3  ;;  %s174_s27 = scalar_lea.vmem [#allocation5], %s546_s16 }
  0x1c   : > { %p190_p3 = pnand %p548_p1, %p189_p2  ;;  %s180_s19 = scalar_lea.hbm %s1023_s1, %s547_s18 }
  0x1d   : > { %s184_s28 = sshll.u32 %s174_s27, 4  ;;  %s182_s29 = sshll.u32 %s180_s19, 4  ;;  %s185_s28 = int_to_ptr.vmem [resolvable:$true] %s184_s28  ;;  %s183_s29 = int_to_ptr.hbm [resolvable:$true] %s182_s29 }
  0x1e   : > { %s171_s30 = scalar_lea.sflag [#allocation6], %s146_s25  ;;  %193 = sbr.rel (%p190_p3) target bundleno = 95 (0x5f), region = 28 }
  0x1f   : > { %601 = dma.hbm_to_vmem [thread:$0]  (!%p912_p0), %s183_s29, 128, %s185_s28, %s171_s30  }
  0x20   : > { %s927_s3 = sand.u32 (!%p190_p3), 1, %s803_s10  }
  0x21   : > { %s549_s4 = sshll.u32 (!%p190_p3), %s927_s3, 5  ;;  %s196_s5 = scalar_lea.sflag (!%p190_p3), [#allocation3], %s927_s3 }
  0x22   : > { %s199_s7 = scalar_lea.vmem (!%p190_p3), [#allocation2], %s549_s4 }
  0x23   : > { %786 = dma.done.wait (%p888_p8), %s196_s5, 512  }
  0x24   : > { %788 = vsyncadd (%p888_p8), %s196_s5, 4294966784  ;;  %s550_s25 = sshll.u32 %s927_s3, 3  ;;  %s206_s6 = scalar_lea.sflag [#allocation6], %s927_s3 }
  0x25   : > { %s209_s8 = scalar_lea.vmem [#allocation5], %s550_s25 }
  0x26   : > { %790 = dma.done.wait (%p888_p8), %s206_s6, 128  }
  0x27   : > { %792 = vsyncadd (%p888_p8), %s206_s6, 4294967168  ;;  %v267_v0 = vlaneseq  ;;  %v256_v2 = vld [vmem:[%s199_s7] sm:$0xff]  ;;  %v257_v3 = vld [vmem:[%s199_s7 + $0x8] sm:$0xff]  ;;  %s587_s15 = smul.u32 112, %s927_s3  ;;  %v823_v12 = vmov 0.0   ;;  %s407_s27 = scalar_lea.sflag [#allocation4], %s927_s3 }
  0x28   : > { %v258_v4 = vld [vmem:[%s199_s7 + $0x10] sm:$0xff]  ;;  %v259_v5 = vld [vmem:[%s199_s7 + $0x18] sm:$0xff]  ;;  %v260_v6 = vld [vmem:[%s209_s8] sm:$0xff]  ;;  %v281_v9 = vmax.f32 %v256_v2, %v257_v3  ;;  %s588_s16 = smul.u32 112, %s811_s12  ;;  %s753_s5 = scalar_lea.hbm %s1024_s2, 224 }
  0x29   : > { %v268_v1 = vshrl.u32 %v267_v0, 7  ;;  %v270_v7 = vand.u32 127, %v267_v0  ;;  %v282_v10 = vmax.f32 %v258_v4, %v259_v5  ;;  %vm261_vm0 = vcmp.ne.s32.totalorder %v260_v6, 255  ;;  %s946_s21 = scalar_lea.vmem [#allocation7], %s587_s15 }
  0x2a   : > { %v551_v13 = vsel %vm261_vm0, 1.0, %v823_v12  ;;  %v264_v22 = vsel %vm261_vm0, %v260_v6, 0  ;;  %s420_s20 = scalar_lea.hbm %s1024_s2, %s588_s16  ;;  %s421_s26 = sshll.u32 %s946_s21, 4  ;;  %s422_s26 = int_to_ptr.vmem [resolvable:$true] %s421_s26 }
  0x2b   : > { %v271_v8 = vmul.u32 128, %v268_v1  ;;  %v283_v11 = vmax.f32 %v281_v9, %v282_v10  ;;  %558 = vst [vmem:[%s946_s21 + $0x8] sm:$0xff] %v551_v13  ;;  %s423_s19 = sshll.u32 %s420_s20, 4  ;;  %s424_s19 = int_to_ptr.hbm [resolvable:$true] %s423_s19 }
  0x2c   : > { %s747_s28 = sshra.s32 %s424_s19, 4  ;;  %s748_s28 = int_to_ptr.hbm [resolvable:$true] %s747_s28 }
  0x2d   : > { %v943_v14 = vadd.s32 %v271_v8, %v270_v7  ;;  %v284_v15 = vsub.f32 %v256_v2, %v283_v11  ;;  %v285_v16 = vsub.f32 %v257_v3, %v283_v11  ;;  %v286_v17 = vsub.f32 %v258_v4, %v283_v11  ;;  %s749_s29 = scalar_lea.hbm %s748_s28, 112  ;;  %p754_p7 = scmp.lt.s32.totalorder %s748_s28, %s1024_s2 }
  0x2e   : > { %v287_v18 = vsub.f32 %v259_v5, %v283_v11  ;;  %p750_p4 = scmp.ne.s32.totalorder %s748_s28, %s749_s29  ;;  %p755_p8 = scmp.lt.s32.totalorder %s753_s5, %s749_s29 }
  0x2f   : > { %v288_v19 = vmul.f32 1.442695, %v284_v15  ;;  %v290_v20 = vmul.f32 1.442695, %v285_v16  ;;  %v292_v21 = vmul.f32 1.442695, %v286_v17 }
  0x30   : > { %vm275_vm1 = vcmp.lt.s32.totalorder %v943_v14, 256  ;;  %v294_v23 = vmul.f32 1.442695, %v287_v18  ;;  %p751_p5 = pnand %p750_p4, %p892_p9  ;;  %p756_p10 = por %p755_p8, %p754_p7 }
  0x31   : > { %661 = vpow2.f32 %v288_v19  ;;  %v276_v24 = vsel %vm275_vm1, %v264_v22, 4  ;;  %v552_v61 = vsel %vm275_vm1, 1.0, %v823_v12 }
  0x32   : > { %663 = vpow2.f32 %v290_v20  ;;  %vm277_vm2 = vcmp.eq.s32.totalorder %v276_v24, 0  ;;  %vm278_vm3 = vcmp.eq.s32.totalorder %v276_v24, 1  ;;  %vm279_vm4 = vcmp.eq.s32.totalorder %v276_v24, 2  ;;  %p752_p6 = pneg %p751_p5 }
  0x33   : > { %665 = vpow2.f32 %v292_v21  ;;  %vm280_vm5 = vcmp.eq.s32.totalorder %v276_v24, 3  ;;  %v319_v29 = vsel %vm277_vm2, %v284_v15, 0.0  ;;  %v320_v30 = vsel %vm278_vm3, %v285_v16, 0.0 }
  0x34   : > { %667 = vpow2.f32 %v294_v23  ;;  %v553_v32 = vsel %vm277_vm2, 1.0, %v823_v12  ;;  %v554_v33 = vsel %vm278_vm3, 1.0, %v823_v12  ;;  %v555_v34 = vsel %vm279_vm4, 1.0, %v823_v12  ;;  %p757_p13 = pnand %p756_p10, %p752_p6 }
  0x35   : > { %v556_v35 = vsel %vm280_vm5, 1.0, %v823_v12  ;;  %v323_v37 = vadd.f32 %v320_v30, %v319_v29  ;;  %v321_v39 = vsel %vm279_vm4, %v286_v17, 0.0  ;;  %579 = vst [vmem:[%s946_s21 + $0x50] sm:$0xff] %v553_v32  ;;  %v322_v41 = vsel %vm280_vm5, %v287_v18, 0.0 }
  0x36   : > { %580 = vst [vmem:[%s946_s21 + $0x58] sm:$0xff] %v554_v33 }
  0x37   : > { %v662_v25 = vpop.eup %661  ;;  %581 = vst [vmem:[%s946_s21 + $0x60] sm:$0xff] %v555_v34  ;;  %v324_v40 = vadd.f32 %v323_v37, %v321_v39 }
  0x38   : > { %v664_v26 = vpop.eup %663  ;;  %582 = vst [vmem:[%s946_s21 + $0x68] sm:$0xff] %v556_v35 }
  0x39   : > { %v666_v27 = vpop.eup %665  ;;  %v296_v28 = vadd.f32 %v664_v26, %v662_v25  ;;  %v325_v42 = vadd.f32 %v324_v40, %v322_v41 }
  0x3a   : > { %v668_v31 = vpop.eup %667 }
  0x3b   : > { %v297_v36 = vadd.f32 %v666_v27, %v296_v28 }
  0x3d   : > { %v298_v38 = vadd.f32 %v668_v31, %v297_v36 }
  0x3f   : > { %669 = vlog2.f32 %v298_v38  ;;  %v312_v48 = vand.u32 2147483648, %v298_v38  ;;  %vm306_vm6 = vweird.f32 %v298_v38  ;;  %v310_v50 = vand.u32 2147483647, %v298_v38 }
  0x40   : > { %671 = vrcp.f32 %v298_v38 }
  0x41   : > { %v313_v53 = vor.u32 1.1754944e-38, %v312_v48  ;;  %vm311_vm9 = vcmp.eq.f32.partialorder %v310_v50, 8.507059e+37 }
  0x45   : > { %v670_v43 = vpop.eup %669 }
  0x46   : > { %v672_v44 = vpop.eup %671  ;;  %v300_v45 = vmul.f32 0.6931472, %v670_v43 }
  0x47   : > { %v302_v46 = vmul.f32 %v672_v44, %v298_v38  ;;  %vm307_vm7 = vweird.f32 %v672_v44 }
  0x48   : > { %v326_v47 = vsub.f32 %v300_v45, %v325_v42  ;;  %vm308_vm8 = vmor %vm306_vm6, %vm307_vm7 }
  0x49   : > { %v303_v49 = vsub.f32 1.0, %v302_v46 }
  0x4a   : > { %v327_v51 = vmul.f32 %v551_v13, %v326_v47 }
  0x4b   : > { %v304_v52 = vmul.f32 %v672_v44, %v303_v49 }
  0x4c   : > { %362 = vst [vmem:[%s946_s21] sm:$0xff] %v327_v51 }
  0x4d   : > { %v305_v54 = vadd.f32 %v672_v44, %v304_v52 }
  0x4f   : > { %v309_v55 = vsel %vm308_vm8, %v672_v44, %v305_v54 }
  0x50   : > { %v314_v56 = vsel %vm311_vm9, %v313_v53, %v309_v55 }
  0x51   : > { %v315_v57 = vmul.f32 %v662_v25, %v314_v56  ;;  %v316_v58 = vmul.f32 %v664_v26, %v314_v56  ;;  %v317_v59 = vmul.f32 %v666_v27, %v314_v56  ;;  %v318_v60 = vmul.f32 %v668_v31, %v314_v56 }
  0x53   : > { %v330_v62 = vsel %vm277_vm2, %v315_v57, 0.0  ;;  %v331_v63 = vsel %vm278_vm3, %v316_v58, 0.0  ;;  %v332_v0 = vsel %vm279_vm4, %v317_v59, 0.0  ;;  %v333_v1 = vsel %vm280_vm5, %v318_v60, 0.0 }
  0x54   : > { %v340_v2 = vmul.f32 %v552_v61, %v315_v57  ;;  %v341_v3 = vmul.f32 %v552_v61, %v316_v58  ;;  %v342_v4 = vmul.f32 %v552_v61, %v317_v59  ;;  %v343_v5 = vmul.f32 %v552_v61, %v318_v60  ;;  %563 = vst [vmem:[%s946_s21 + $0x10] sm:$0xff] %v330_v62 }
  0x55   : > { %564 = vst [vmem:[%s946_s21 + $0x18] sm:$0xff] %v331_v63 }
  0x56   : > { %565 = vst [vmem:[%s946_s21 + $0x20] sm:$0xff] %v332_v0 }
  0x57   : > { %566 = vst [vmem:[%s946_s21 + $0x28] sm:$0xff] %v333_v1 }
  0x58   : > { %571 = vst [vmem:[%s946_s21 + $0x30] sm:$0xff] %v340_v2 }
  0x59   : > { %572 = vst [vmem:[%s946_s21 + $0x38] sm:$0xff] %v341_v3 }
  0x5a   : > { %573 = vst [vmem:[%s946_s21 + $0x40] sm:$0xff] %v342_v4 }
  0x5b   : > { %574 = vst [vmem:[%s946_s21 + $0x48] sm:$0xff] %v343_v5 }
  0x5c   : > { %760 = shalt.err (!%p757_p13)
}
  0x5d   : > { %s824_s3 = smov 128   ;;  %s825_s6 = smov 8  }
  0x5e   : > { %593 = dma.vmem_to_hbm [thread:$0]  (%p892_p9), %s422_s26, 1792, %s424_s19, %s407_s27, %s824_s3, %s824_s3, %s825_s6  }
  0x5f PF: > { %s438_s8 = sand.u32 1, %s799_s9   ;;  %p603_p0 = pnand %p542_p12, %p899_p11 }
  0x60   : > { %s439_s15 = scalar_lea.sflag [#allocation4], %s438_s8 }
  0x61   : > { %p604_p1 = pneg %p603_p0 }
  0x63   : > { %794 = dma.done.wait (%p604_p1), %s439_s15, 1792  }
  0x64   : > { %796 = vsyncadd (%p604_p1), %s439_s15, 4294965504  ;;  %s21_s14 = sadd.s32 1, %s819_s14   ;;  %s1030_s9 = smov %s803_s10 }
  0x65   : > { %p18_p2 = scmp.ge.s32.totalorder %s21_s14, 4   ;;  %s1031_s10 = smov %s807_s11 }
  0x66   : > { %s1032_s11 = smov %s897_s23  ;;  %s1033_s12 = smov %s815_s13 }
  0x67   : > { %s1034_s13 = smov %s1036_s17  ;;  %20 = sbr.rel (!%p18_p2) target bundleno = 8 (0x8), region = 94 }
  0x6c   :  { %445 = vsyncpa [#allocation3], 1 }
  0x6d   :  { %447 = vsyncpa [#allocation3 + $0x1], 1 }
  0x6e   :  { %448 = vsyncpa [#allocation6], 1 }
  0x6f   :  { %450 = vsyncpa [#allocation6 + $0x1], 1 }
  0x70   :  { %451 = vsyncpa [#allocation4], 1 }
  0x71   :  { %453 = vsyncpa [#allocation4 + $0x1], 1 }

</bundles_post_ra>
